<compile_context>
chip_gen: v7x
topology: tpu7x:2x2x1
jax: 0.10.0
libtpu: 0.0.40
codegen_flags: <defaults>
</compile_context>

<pallas_src>
import functools

import jax
import jax.numpy as jnp
from jax import lax
from jax.experimental import pallas as pl
from jax.experimental.pallas import tpu as pltpu


def _round_up(x, m):
    return ((x + m - 1) // m) * m


def _vmem_limit_bytes(step_input_bytes, step_output_bytes, scratch_bytes):
    # 2x for double-buffering of pipelined blocks, plus scratch and headroom.
    est = 2 * (step_input_bytes + step_output_bytes) + scratch_bytes + (4 << 20)
    return int(min(max(est, 16 << 20), 128 << 20))


# ------------------------- in-kernel helpers (traced) -------------------------

def _activate(y, activation):
    if activation == 'relu':
        return jnp.maximum(y, 0.0)
    if activation == 'lrelu':
        return jnp.where(y >= 0.0, y, 0.2 * y)
    if activation == 'tanh':
        return jnp.tanh(y)
    if activation == 'sig':
        # exp and the (approx) reciprocal both run on the EUP slot.
        return pl.reciprocal(1.0 + jnp.exp(-y), approx=True)
    return y


def _instance_norm(y, mask, inv_cnt, eps):
    """Per-channel (row) normalization over the lane axis.

    y:    (C, L) f32, spatial on lanes
    mask: (1, L) f32 validity mask or None (all lanes valid)
    One-pass stats: var = E[y^2] - mean^2 (biased, matching InstanceNorm2d).
    Stats are kept in f32 even when the matmul ran in bf16.
    """
    ym = y if mask is None else y * mask
    s1 = jnp.sum(ym, axis=1, keepdims=True)          # (C, 1)
    s2 = jnp.sum(ym * y, axis=1, keepdims=True)      # masked y^2
    mean = s1 * inv_cnt
    var = jnp.maximum(s2 * inv_cnt - mean * mean, 0.0)
    return (y - mean) * lax.rsqrt(var + eps)


# ------------------------- fused kernel (stride == 1) -------------------------

def _fused_conv_kernel(x_ref, w_ref, mask_ref, *rest,
                       k, c_in, Wp, Lpad, inv_cnt, activation, norm, eps,
                       need_mask):
    """One (batch, C_out-tile): fused im2col conv + InstanceNorm + activation.

    x_ref:    (1, C_in, flat_pad)     flattened zero-padded image
    w_ref:    (k, ct, k*C_in)         row-stacked per-tap weights
    mask_ref: (1, Lpad)               1.0 where the wide column is a real output
    b_ref:    (ct, 1)                 only present when norm=False
    o_ref:    (1, ct, Lpad)           "wide" output, spatial (h*Wp + w) on lanes
    rhs_scr:  (k*C_in, Lpad)          stacked shifted windows (compute dtype)
    acc_scr:  (ct, Lpad) f32          MXU accumulator
    """
    if norm:
        o_ref, rhs_scr, acc_scr = rest
        b_ref = None
    else:
        b_ref, o_ref, rhs_scr, acc_scr = rest

    acc_scr[...] = jnp.zeros_like(acc_scr)
    # k matmuls of depth k*C_in: per kernel row i, stack the k column-shifted
    # windows of the flattened padded image along sublanes, then one MXU push.
    for i in range(k):
        for j in range(k):
            d = i * Wp + j                                   # static lane offset
            rhs_scr[pl.ds(j * c_in, c_in), :] = x_ref[0, :, pl.ds(d, Lpad)]
        acc_scr[...] += jnp.dot(w_ref[i], rhs_scr[...],
                                preferred_element_type=jnp.float32)

    y = acc_scr[...]
    if b_ref is not None:                                    # bias only when no norm
        y = y + b_ref[...]                                   # (ct,1) bcast on lanes
    if norm:
        y = _instance_norm(y, mask_ref[...] if need_mask else None, inv_cnt, eps)
    y = _activate(y, activation)
    o_ref[0] = y.astype(o_ref.dtype)


def _fused_forward(x, weight, bias, *, k, p, activation, norm, eps, compute_dtype):
    """Stride-1 path: fused im2col + conv + norm + act, NCHW-native output."""
    N, C_in, H, W = x.shape
    C_out = weight.shape[0]
    Hp, Wp = H + 2 * p, W + 2 * p
    Ho, Wo = Hp - k + 1, Wp - k + 1

    L = Ho * Wp                                          # "wide" spatial length
    Lpad = _round_up(L, 128)                             # lane-dense output
    d_max = (k - 1) * Wp + (k - 1)
    flat_pad = _round_up(max(Hp * Wp, d_max + Lpad), 128)

    xp = jnp.pad(x.astype(jnp.float32), ((0, 0), (0, 0), (p, p), (p, p)))
    xf = xp.reshape(N, C_in, Hp * Wp)                    # contiguous -> free reshape
    xf = jnp.pad(xf, ((0, 0), (0, 0), (0, flat_pad - Hp * Wp)))
    xf = xf.astype(compute_dtype)

    # weight[o, c, i, j] -> row-stacked taps wk[i, o, j*C_in + c]
    wk = jnp.transpose(weight.astype(jnp.float32), (2, 0, 3, 1))
    wk = wk.reshape(k, C_out, k * C_in).astype(compute_dtype)

    # wide column m = h*Wp + w is a real output iff (m % Wp) < Wo and m < Ho*Wp
    m = jnp.arange(Lpad)
    mask = (((m % Wp) < Wo) & (m < L)).astype(jnp.float32).reshape(1, Lpad)
    need_mask = (Wo < Wp) or (L < Lpad)

    # Split C_out into two 'parallel' tiles when it stays sublane-aligned so
    # v7x's second TensorCore has work even at N == 1 (no-op on v5e/v6e).
    n_ct = 2 if (C_out >= 16 and C_out % 16 == 0) else 1
    ct = C_out // n_ct

    inputs = [xf, wk, mask]
    in_specs = [
        pl.BlockSpec((1, C_in, flat_pad), lambda n, co: (n, 0, 0)),
        pl.BlockSpec((k, ct, k * C_in), lambda n, co: (0, co, 0)),
        pl.BlockSpec((1, Lpad), lambda n, co: (0, 0)),
    ]
    if not norm:
        inputs.append(bias.astype(jnp.float32).reshape(C_out, 1))
        in_specs.append(pl.BlockSpec((ct, 1), lambda n, co: (co, 0)))

    itemsize = jnp.dtype(compute_dtype).itemsize
    step_in = (C_in * flat_pad + k * ct * k * C_in) * itemsize + Lpad * 4 + C_out * 4
    step_out = ct * Lpad * 4
    scratch = k * C_in * Lpad * itemsize + ct * Lpad * 4
    vmem_limit = _vmem_limit_bytes(step_in, step_out, scratch)

    kernel = functools.partial(
        _fused_conv_kernel, k=k, c_in=C_in, Wp=Wp, Lpad=Lpad,
        inv_cnt=1.0 / float(Ho * Wo), activation=activation, norm=norm,
        eps=eps, need_mask=need_mask)

    out_wide = pl.pallas_call(
        kernel,
        out_shape=jax.ShapeDtypeStruct((N, C_out, Lpad), jnp.float32),
        grid_spec=pltpu.PrefetchScalarGridSpec(
            num_scalar_prefetch=0,
            grid=(N, n_ct),
            in_specs=in_specs,
            out_specs=pl.BlockSpec((1, ct, Lpad), lambda n, co: (n, co, 0)),
            scratch_shapes=[
                pltpu.VMEM((k * C_in, Lpad), compute_dtype),
                pltpu.VMEM((ct, Lpad), jnp.float32),
            ]),
        compiler_params=pltpu.CompilerParams(
            dimension_semantics=("parallel", "parallel"),
            vmem_limit_bytes=vmem_limit),
    )(*inputs)

    # TODO(synk): keep the wide layout between chained conv_blocks; this slice
    # is an extra HBM read+write of the output.
    out = out_wide[:, :, :L].reshape(N, C_out, Ho, Wp)[:, :, :, :Wo]
    return out


# ------------------------- fallback kernel (stride != 1) -------------------------

def _gemm_conv_kernel(p_ref, w_ref, mask_ref, *rest,
                      inv_cnt, activation, norm, eps, need_mask):
    """One batch element: (C_out, K) @ (K, HWpad) GEMM + norm + activation."""
    if norm:
        (o_ref,) = rest
        b_ref = None
    else:
        b_ref, o_ref = rest

    y = jnp.dot(w_ref[...], p_ref[0], preferred_element_type=jnp.float32)
    if b_ref is not None:
        y = y + b_ref[...]
    if norm:
        y = _instance_norm(y, mask_ref[...] if need_mask else None, inv_cnt, eps)
    y = _activate(y, activation)
    o_ref[0] = y.astype(o_ref.dtype)


def _im2col_khw(x, k, s, p):
    """x: (N, C, H, W) -> patches (N, C*k*k, Ho*Wo), Ho, Wo. Spatial stays last."""
    N, C, H, W = x.shape
    xp = jnp.pad(x, ((0, 0), (0, 0), (p, p), (p, p)))
    Ho = (H + 2 * p - k) // s + 1
    Wo = (W + 2 * p - k) // s + 1
    cols = []
    for i in range(k):
        for j in range(k):
            cols.append(xp[:, :, i:i + s * Ho:s, j:j + s * Wo:s])   # (N, C, Ho, Wo)
    patches = jnp.stack(cols, axis=2).reshape(N, C * k * k, Ho * Wo)
    return patches, Ho, Wo


def _gemm_forward(x, weight, bias, *, k, s, p, activation, norm, eps, compute_dtype):
    N, C_in, H, W = x.shape
    C_out = weight.shape[0]
    patches, Ho, Wo = _im2col_khw(x.astype(jnp.float32), k, s, p)   # (N, K, HW)
    K = C_in * k * k
    HW = Ho * Wo
    HWpad = _round_up(HW, 128)                                      # lane-dense stores
    patches = jnp.pad(patches, ((0, 0), (0, 0), (0, HWpad - HW))).astype(compute_dtype)
    w2d = weight.reshape(C_out, K).astype(compute_dtype)

    mmask = (jnp.arange(HWpad) < HW).astype(jnp.float32).reshape(1, HWpad)
    need_mask = HWpad > HW

    inputs = [patches, w2d, mmask]
    in_specs = [
        pl.BlockSpec((1, K, HWpad), lambda n: (n, 0, 0)),
        pl.BlockSpec((C_out, K), lambda n: (0, 0)),
        pl.BlockSpec((1, HWpad), lambda n: (0, 0)),
    ]
    if not norm:
        inputs.append(bias.astype(jnp.float32).reshape(C_out, 1))
        in_specs.append(pl.BlockSpec((C_out, 1), lambda n: (0, 0)))

    itemsize = jnp.dtype(compute_dtype).itemsize
    step_in = (K * HWpad + C_out * K) * itemsize + HWpad * 4 + C_out * 4
    step_out = C_out * HWpad * 4
    vmem_limit = _vmem_limit_bytes(step_in, step_out, 0)

    kernel = functools.partial(
        _gemm_conv_kernel, inv_cnt=1.0 / float(HW),
        activation=activation, norm=norm, eps=eps, need_mask=need_mask)

    # TODO(synk): tile HW (and K) for very large strided layers; whole-(K, HW)
    # slabs per grid step are fine at CycleGAN sizes but not fully generic.
    out = pl.pallas_call(
        kernel,
        out_shape=jax.ShapeDtypeStruct((N, C_out, HWpad), jnp.float32),
        grid_spec=pltpu.PrefetchScalarGridSpec(
            num_scalar_prefetch=0,
            grid=(N,),
            in_specs=in_specs,
            out_specs=pl.BlockSpec((1, C_out, HWpad), lambda n: (n, 0, 0)),
        ),
        compiler_params=pltpu.CompilerParams(
            dimension_semantics=("parallel",),
            vmem_limit_bytes=vmem_limit),
    )(*inputs)
    return out[:, :, :HW].reshape(N, C_out, Ho, Wo)


# ------------------------- public wrapper -------------------------

def conv_block_forward(x, weight, bias, *, k, s, p,
                       activation='relu', norm=True, eps=1e-5,
                       compute_dtype=jnp.bfloat16):
    """Forward pass of conv_block.

    x:      (N, C_in, H, W)   float32, NCHW like PyTorch
    weight: (C_out, C_in, k, k)
    bias:   (C_out,)
    compute_dtype: matmul operand dtype (bf16 default; f32 accumulation/stats).
    returns (N, C_out, Ho, Wo) float32
    """
    if s == 1:
        return _fused_forward(x, weight, bias, k=k, p=p, activation=activation,
                              norm=norm, eps=eps, compute_dtype=compute_dtype)
    # Strided convs: lane-dense GEMM over wrapper-side im2col.
    return _gemm_forward(x, weight, bias, k=k, s=s, p=p, activation=activation,
                         norm=norm, eps=eps, compute_dtype=compute_dtype)


# ------------------------- pure-JAX reference -------------------------

def _reference(x, weight, bias, *, k, s, p, activation='relu', norm=True, eps=1e-5):
    y = lax.conv_general_dilated(
        x.astype(jnp.float32), weight.astype(jnp.float32),
        window_strides=(s, s), padding=[(p, p), (p, p)],
        dimension_numbers=('NCHW', 'OIHW', 'NCHW'))
    y = y + bias.reshape(1, -1, 1, 1)
    if norm:
        mean = jnp.mean(y, axis=(2, 3), keepdims=True)
        var = jnp.mean((y - mean) ** 2, axis=(2, 3), keepdims=True)
        y = (y - mean) * lax.rsqrt(var + eps)
    if activation == 'relu':
        y = jnp.maximum(y, 0.0)
    elif activation == 'lrelu':
        y = jnp.where(y >= 0, y, 0.2 * y)
    elif activation == 'tanh':
        y = jnp.tanh(y)
    elif activation == 'sig':
        y = jax.nn.sigmoid(y)
    return y


# ------------------------- main -------------------------

if __name__ == "__main__":
    # Small shapes consistent with conv_block(ch_in=4, ch_out=8, k=3, s=1, p=1)
    N, C_in, H, W = 2, 4, 16, 16
    C_out, k, p = 8, 3, 1

    key = jax.random.PRNGKey(0)
    kx, kw, kb = jax.random.split(key, 3)
    x = jax.random.normal(kx, (N, C_in, H, W), dtype=jnp.float32)
    bound = 1.0 / (C_in * k * k) ** 0.5
    weight = jax.random.uniform(kw, (C_out, C_in, k, k),
                                minval=-bound, maxval=bound, dtype=jnp.float32)
    bias = jax.random.uniform(kb, (C_out,),
                              minval=-bound, maxval=bound, dtype=jnp.float32)

    # Case 1: default conv_block config (InstanceNorm + ReLU), bf16 matmuls.
    out = jax.block_until_ready(conv_block_forward(
        x, weight, bias, k=k, s=1, p=p, activation='relu', norm=True))
    ref = jax.block_until_ready(_reference(
        x, weight, bias, k=k, s=1, p=p, activation='relu', norm=True))
    assert out.shape == (N, C_out, H, W), out.shape
    err = float(jnp.max(jnp.abs(out - ref)))
    assert err < 0.15, f"bf16 fused: {err}"

    # Case 2: same config in full f32 (exact-parity check of the fused kernel).
    out_f32 = jax.block_until_ready(conv_block_forward(
        x, weight, bias, k=k, s=1, p=p, activation='relu', norm=True,
        compute_dtype=jnp.float32))
    err_f32 = float(jnp.max(jnp.abs(out_f32 - ref)))
    assert err_f32 < 1e-3, f"f32 fused: {err_f32}"

    # Case 3: norm=False + leaky-relu (exercises the bias path).
    out2 = jax.block_until_ready(conv_block_forward(
        x, weight, bias, k=k, s=1, p=p, activation='lrelu', norm=False))
    ref2 = jax.block_until_ready(_reference(
        x, weight, bias, k=k, s=1, p=p, activation='lrelu', norm=False))
    err2 = float(jnp.max(jnp.abs(out2 - ref2)))
    assert err2 < 0.15, f"bf16 no-norm: {err2}"

    # Case 4: stride 2 (fallback lane-dense GEMM path) + tanh + norm.
    out3 = jax.block_until_ready(conv_block_forward(
        x, weight, bias, k=k, s=2, p=p, activation='tanh', norm=True))
    ref3 = jax.block_until_ready(_reference(
        x, weight, bias, k=k, s=2, p=p, activation='tanh', norm=True))
    assert out3.shape == ref3.shape == (N, C_out, 8, 8), out3.shape
    err3 = float(jnp.max(jnp.abs(out3 - ref3)))
    assert err3 < 0.15, f"bf16 strided: {err3}"

    print("KERNEL_OK")
</pallas_src>

<mosaic_0001>
module attributes {stable_mosaic.version = 11 : i64} {
  func.func @_fused_conv_kernel(%arg0: i32, %arg1: i32, %arg2: memref<1x4x512xbf16, #tpu.memory_space<vmem>>, %arg3: memref<3x8x12xbf16, #tpu.memory_space<vmem>>, %arg4: memref<1x384xf32, #tpu.memory_space<vmem>>, %arg5: memref<1x8x384xf32, #tpu.memory_space<vmem>>, %arg6: memref<12x384xbf16, #tpu.memory_space<vmem>>, %arg7: memref<8x384xf32, #tpu.memory_space<vmem>>) attributes {dimension_semantics = [#tpu.dimension_semantics<parallel>, #tpu.dimension_semantics<parallel>], iteration_bounds = array<i64: 2, 1>, scalar_prefetch = 0 : i64, scratch_operands = 2 : i64, tpu.core_type = #tpu.core_type<tc>, window_params = [{transform_indices = @transform_0, window_bounds = array<i64: 1, 4, 512>}, {transform_indices = @transform_1, window_bounds = array<i64: 3, 8, 12>}, {pipeline_mode = #tpu.pipeline_mode<synchronous>, transform_indices = @transform_2, window_bounds = array<i64: 1, 384>}, {transform_indices = @transform_3, window_bounds = array<i64: 1, 8, 384>}]} {
    %cst = arith.constant 0.000000e+00 : f32
    %0 = vector.broadcast %cst : f32 to vector<8x384xf32>
    %c0 = arith.constant 0 : index
    %c0_0 = arith.constant 0 : index
    %1 = vector.load %arg7[%c0, %c0_0] : memref<8x384xf32, #tpu.memory_space<vmem>>, vector<8x384xf32>
    tpu.vector_store %arg7[%c0, %c0_0], %0 {strides = array<i32>} : memref<8x384xf32, #tpu.memory_space<vmem>>, vector<8x384xf32>,
    %c0_1 = arith.constant 0 : index
    %c0_2 = arith.constant 0 : index
    %c0_3 = arith.constant 0 : index
    %2 = vector.load %arg2[%c0_1, %c0_2, %c0_3] : memref<1x4x512xbf16, #tpu.memory_space<vmem>>, vector<1x4x384xbf16>
    %3 = vector.shape_cast %2 : vector<1x4x384xbf16> to vector<4x384xbf16>
    %c0_4 = arith.constant 0 : index
    %c0_5 = arith.constant 0 : index
    %4 = vector.load %arg6[%c0_4, %c0_5] : memref<12x384xbf16, #tpu.memory_space<vmem>>, vector<4x384xbf16>
    tpu.vector_store %arg6[%c0_4, %c0_5], %3 {strides = array<i32>} : memref<12x384xbf16, #tpu.memory_space<vmem>>, vector<4x384xbf16>,
    %c0_6 = arith.constant 0 : index
    %c0_7 = arith.constant 0 : index
    %c1 = arith.constant 1 : index
    %5 = vector.load %arg2[%c0_6, %c0_7, %c1] : memref<1x4x512xbf16, #tpu.memory_space<vmem>>, vector<1x4x384xbf16>
    %6 = vector.shape_cast %5 : vector<1x4x384xbf16> to vector<4x384xbf16>
    %c4 = arith.constant 4 : index
    %c0_8 = arith.constant 0 : index
    %7 = vector.load %arg6[%c4, %c0_8] : memref<12x384xbf16, #tpu.memory_space<vmem>>, vector<4x384xbf16>
    tpu.vector_store %arg6[%c4, %c0_8], %6 {strides = array<i32>} : memref<12x384xbf16, #tpu.memory_space<vmem>>, vector<4x384xbf16>,
    %c0_9 = arith.constant 0 : index
    %c0_10 = arith.constant 0 : index
    %c2 = arith.constant 2 : index
    %8 = vector.load %arg2[%c0_9, %c0_10, %c2] : memref<1x4x512xbf16, #tpu.memory_space<vmem>>, vector<1x4x384xbf16>
    %9 = vector.shape_cast %8 : vector<1x4x384xbf16> to vector<4x384xbf16>
    %c8 = arith.constant 8 : index
    %c0_11 = arith.constant 0 : index
    %10 = vector.load %arg6[%c8, %c0_11] : memref<12x384xbf16, #tpu.memory_space<vmem>>, vector<4x384xbf16>
    tpu.vector_store %arg6[%c8, %c0_11], %9 {strides = array<i32>} : memref<12x384xbf16, #tpu.memory_space<vmem>>, vector<4x384xbf16>,
    %c0_12 = arith.constant 0 : index
    %c0_13 = arith.constant 0 : index
    %11 = vector.load %arg7[%c0_12, %c0_13] : memref<8x384xf32, #tpu.memory_space<vmem>>, vector<8x384xf32>
    %c0_14 = arith.constant 0 : index
    %c0_15 = arith.constant 0 : index
    %c0_16 = arith.constant 0 : index
    %12 = vector.load %arg3[%c0_14, %c0_15, %c0_16] : memref<3x8x12xbf16, #tpu.memory_space<vmem>>, vector<1x8x12xbf16>
    %13 = vector.shape_cast %12 : vector<1x8x12xbf16> to vector<8x12xbf16>
    %c0_17 = arith.constant 0 : index
    %c0_18 = arith.constant 0 : index
    %14 = vector.load %arg6[%c0_17, %c0_18] : memref<12x384xbf16, #tpu.memory_space<vmem>>, vector<12x384xbf16>
    %cst_19 = arith.constant dense<0.000000e+00> : vector<8x384xf32>
    %15 = tpu.matmul %13, %14, %cst_19 {dimension_numbers = #tpu.dot_dimension_numbers<[1], [0], [0], [1], [0, 0, 1, 1], [], []>} : vector<8x12xbf16>, vector<12x384xbf16>, vector<8x384xf32> -> vector<8x384xf32>
    %16 = arith.addf %11, %15 : vector<8x384xf32>
    %c0_20 = arith.constant 0 : index
    %c0_21 = arith.constant 0 : index
    %17 = vector.load %arg7[%c0_20, %c0_21] : memref<8x384xf32, #tpu.memory_space<vmem>>, vector<8x384xf32>
    tpu.vector_store %arg7[%c0_20, %c0_21], %16 {strides = array<i32>} : memref<8x384xf32, #tpu.memory_space<vmem>>, vector<8x384xf32>,
    %c0_22 = arith.constant 0 : index
    %c0_23 = arith.constant 0 : index
    %c18 = arith.constant 18 : index
    %18 = vector.load %arg2[%c0_22, %c0_23, %c18] : memref<1x4x512xbf16, #tpu.memory_space<vmem>>, vector<1x4x384xbf16>
    %19 = vector.shape_cast %18 : vector<1x4x384xbf16> to vector<4x384xbf16>
    %c0_24 = arith.constant 0 : index
    %c0_25 = arith.constant 0 : index
    %20 = vector.load %arg6[%c0_24, %c0_25] : memref<12x384xbf16, #tpu.memory_space<vmem>>, vector<4x384xbf16>
    tpu.vector_store %arg6[%c0_24, %c0_25], %19 {strides = array<i32>} : memref<12x384xbf16, #tpu.memory_space<vmem>>, vector<4x384xbf16>,
    %c0_26 = arith.constant 0 : index
    %c0_27 = arith.constant 0 : index
    %c19 = arith.constant 19 : index
    %21 = vector.load %arg2[%c0_26, %c0_27, %c19] : memref<1x4x512xbf16, #tpu.memory_space<vmem>>, vector<1x4x384xbf16>
    %22 = vector.shape_cast %21 : vector<1x4x384xbf16> to vector<4x384xbf16>
    %c4_28 = arith.constant 4 : index
    %c0_29 = arith.constant 0 : index
    %23 = vector.load %arg6[%c4_28, %c0_29] : memref<12x384xbf16, #tpu.memory_space<vmem>>, vector<4x384xbf16>
    tpu.vector_store %arg6[%c4_28, %c0_29], %22 {strides = array<i32>} : memref<12x384xbf16, #tpu.memory_space<vmem>>, vector<4x384xbf16>,
    %c0_30 = arith.constant 0 : index
    %c0_31 = arith.constant 0 : index
    %c20 = arith.constant 20 : index
    %24 = vector.load %arg2[%c0_30, %c0_31, %c20] : memref<1x4x512xbf16, #tpu.memory_space<vmem>>, vector<1x4x384xbf16>
    %25 = vector.shape_cast %24 : vector<1x4x384xbf16> to vector<4x384xbf16>
    %c8_32 = arith.constant 8 : index
    %c0_33 = arith.constant 0 : index
    %26 = vector.load %arg6[%c8_32, %c0_33] : memref<12x384xbf16, #tpu.memory_space<vmem>>, vector<4x384xbf16>
    tpu.vector_store %arg6[%c8_32, %c0_33], %25 {strides = array<i32>} : memref<12x384xbf16, #tpu.memory_space<vmem>>, vector<4x384xbf16>,
    %c0_34 = arith.constant 0 : index
    %c0_35 = arith.constant 0 : index
    %27 = vector.load %arg7[%c0_34, %c0_35] : memref<8x384xf32, #tpu.memory_space<vmem>>, vector<8x384xf32>
    %c1_36 = arith.constant 1 : index
    %c0_37 = arith.constant 0 : index
    %c0_38 = arith.constant 0 : index
    %28 = vector.load %arg3[%c1_36, %c0_37, %c0_38] : memref<3x8x12xbf16, #tpu.memory_space<vmem>>, vector<1x8x12xbf16>
    %29 = vector.shape_cast %28 : vector<1x8x12xbf16> to vector<8x12xbf16>
    %c0_39 = arith.constant 0 : index
    %c0_40 = arith.constant 0 : index
    %30 = vector.load %arg6[%c0_39, %c0_40] : memref<12x384xbf16, #tpu.memory_space<vmem>>, vector<12x384xbf16>
    %cst_41 = arith.constant dense<0.000000e+00> : vector<8x384xf32>
    %31 = tpu.matmul %29, %30, %cst_41 {dimension_numbers = #tpu.dot_dimension_numbers<[1], [0], [0], [1], [0, 0, 1, 1], [], []>} : vector<8x12xbf16>, vector<12x384xbf16>, vector<8x384xf32> -> vector<8x384xf32>
    %32 = arith.addf %27, %31 : vector<8x384xf32>
    %c0_42 = arith.constant 0 : index
    %c0_43 = arith.constant 0 : index
    %33 = vector.load %arg7[%c0_42, %c0_43] : memref<8x384xf32, #tpu.memory_space<vmem>>, vector<8x384xf32>
    tpu.vector_store %arg7[%c0_42, %c0_43], %32 {strides = array<i32>} : memref<8x384xf32, #tpu.memory_space<vmem>>, vector<8x384xf32>,
    %c0_44 = arith.constant 0 : index
    %c0_45 = arith.constant 0 : index
    %c36 = arith.constant 36 : index
    %34 = vector.load %arg2[%c0_44, %c0_45, %c36] : memref<1x4x512xbf16, #tpu.memory_space<vmem>>, vector<1x4x384xbf16>
    %35 = vector.shape_cast %34 : vector<1x4x384xbf16> to vector<4x384xbf16>
    %c0_46 = arith.constant 0 : index
    %c0_47 = arith.constant 0 : index
    %36 = vector.load %arg6[%c0_46, %c0_47] : memref<12x384xbf16, #tpu.memory_space<vmem>>, vector<4x384xbf16>
    tpu.vector_store %arg6[%c0_46, %c0_47], %35 {strides = array<i32>} : memref<12x384xbf16, #tpu.memory_space<vmem>>, vector<4x384xbf16>,
    %c0_48 = arith.constant 0 : index
    %c0_49 = arith.constant 0 : index
    %c37 = arith.constant 37 : index
    %37 = vector.load %arg2[%c0_48, %c0_49, %c37] : memref<1x4x512xbf16, #tpu.memory_space<vmem>>, vector<1x4x384xbf16>
    %38 = vector.shape_cast %37 : vector<1x4x384xbf16> to vector<4x384xbf16>
    %c4_50 = arith.constant 4 : index
    %c0_51 = arith.constant 0 : index
    %39 = vector.load %arg6[%c4_50, %c0_51] : memref<12x384xbf16, #tpu.memory_space<vmem>>, vector<4x384xbf16>
    tpu.vector_store %arg6[%c4_50, %c0_51], %38 {strides = array<i32>} : memref<12x384xbf16, #tpu.memory_space<vmem>>, vector<4x384xbf16>,
    %c0_52 = arith.constant 0 : index
    %c0_53 = arith.constant 0 : index
    %c38 = arith.constant 38 : index
    %40 = vector.load %arg2[%c0_52, %c0_53, %c38] : memref<1x4x512xbf16, #tpu.memory_space<vmem>>, vector<1x4x384xbf16>
    %41 = vector.shape_cast %40 : vector<1x4x384xbf16> to vector<4x384xbf16>
    %c8_54 = arith.constant 8 : index
    %c0_55 = arith.constant 0 : index
    %42 = vector.load %arg6[%c8_54, %c0_55] : memref<12x384xbf16, #tpu.memory_space<vmem>>, vector<4x384xbf16>
    tpu.vector_store %arg6[%c8_54, %c0_55], %41 {strides = array<i32>} : memref<12x384xbf16, #tpu.memory_space<vmem>>, vector<4x384xbf16>,
    %c0_56 = arith.constant 0 : index
    %c0_57 = arith.constant 0 : index
    %43 = vector.load %arg7[%c0_56, %c0_57] : memref<8x384xf32, #tpu.memory_space<vmem>>, vector<8x384xf32>
    %c2_58 = arith.constant 2 : index
    %c0_59 = arith.constant 0 : index
    %c0_60 = arith.constant 0 : index
    %44 = vector.load %arg3[%c2_58, %c0_59, %c0_60] : memref<3x8x12xbf16, #tpu.memory_space<vmem>>, vector<1x8x12xbf16>
    %45 = vector.shape_cast %44 : vector<1x8x12xbf16> to vector<8x12xbf16>
    %c0_61 = arith.constant 0 : index
    %c0_62 = arith.constant 0 : index
    %46 = vector.load %arg6[%c0_61, %c0_62] : memref<12x384xbf16, #tpu.memory_space<vmem>>, vector<12x384xbf16>
    %cst_63 = arith.constant dense<0.000000e+00> : vector<8x384xf32>
    %47 = tpu.matmul %45, %46, %cst_63 {dimension_numbers = #tpu.dot_dimension_numbers<[1], [0], [0], [1], [0, 0, 1, 1], [], []>} : vector<8x12xbf16>, vector<12x384xbf16>, vector<8x384xf32> -> vector<8x384xf32>
    %48 = arith.addf %43, %47 : vector<8x384xf32>
    %c0_64 = arith.constant 0 : index
    %c0_65 = arith.constant 0 : index
    %49 = vector.load %arg7[%c0_64, %c0_65] : memref<8x384xf32, #tpu.memory_space<vmem>>, vector<8x384xf32>
    tpu.vector_store %arg7[%c0_64, %c0_65], %48 {strides = array<i32>} : memref<8x384xf32, #tpu.memory_space<vmem>>, vector<8x384xf32>,
    %c0_66 = arith.constant 0 : index
    %c0_67 = arith.constant 0 : index
    %50 = vector.load %arg7[%c0_66, %c0_67] : memref<8x384xf32, #tpu.memory_space<vmem>>, vector<8x384xf32>
    %c0_68 = arith.constant 0 : index
    %c0_69 = arith.constant 0 : index
    %51 = vector.load %arg4[%c0_68, %c0_69] : memref<1x384xf32, #tpu.memory_space<vmem>>, vector<1x384xf32>
    %52 = vector.broadcast %51 : vector<1x384xf32> to vector<8x384xf32>
    %53 = arith.mulf %50, %52 : vector<8x384xf32>
    %cst_70 = arith.constant dense<0.000000e+00> : vector<8xf32>
    %54 = vector.multi_reduction <add>, %53, %cst_70 [1] : vector<8x384xf32> to vector<8xf32>
    %55 = vector.shape_cast %54 : vector<8xf32> to vector<8x1xf32>
    %56 = arith.mulf %53, %50 : vector<8x384xf32>
    %cst_71 = arith.constant dense<0.000000e+00> : vector<8xf32>
    %57 = vector.multi_reduction <add>, %56, %cst_71 [1] : vector<8x384xf32> to vector<8xf32>
    %58 = vector.shape_cast %57 : vector<8xf32> to vector<8x1xf32>
    %cst_72 = arith.constant 3.906250e-03 : f32
    %59 = vector.broadcast %cst_72 : f32 to vector<8x1xf32>
    %60 = arith.mulf %55, %59 : vector<8x1xf32>
    %cst_73 = arith.constant 3.906250e-03 : f32
    %61 = vector.broadcast %cst_73 : f32 to vector<8x1xf32>
    %62 = arith.mulf %58, %61 : vector<8x1xf32>
    %63 = arith.mulf %60, %60 : vector<8x1xf32>
    %64 = arith.subf %62, %63 : vector<8x1xf32>
    %cst_74 = arith.constant 0.000000e+00 : f32
    %65 = vector.broadcast %cst_74 : f32 to vector<8x1xf32>
    %66 = arith.maximumf %64, %65 : vector<8x1xf32>
    %67 = vector.broadcast %60 : vector<8x1xf32> to vector<8x384xf32>
    %68 = arith.subf %50, %67 : vector<8x384xf32>
    %cst_75 = arith.constant 9.99999974E-6 : f32
    %69 = vector.broadcast %cst_75 : f32 to vector<8x1xf32>
    %70 = arith.addf %66, %69 : vector<8x1xf32>
    %71 = math.rsqrt %70 : vector<8x1xf32>
    %72 = vector.broadcast %71 : vector<8x1xf32> to vector<8x384xf32>
    %73 = arith.mulf %68, %72 : vector<8x384xf32>
    %cst_76 = arith.constant 0.000000e+00 : f32
    %74 = vector.broadcast %cst_76 : f32 to vector<8x384xf32>
    %75 = arith.maximumf %73, %74 : vector<8x384xf32>
    %c0_77 = arith.constant 0 : index
    %c0_78 = arith.constant 0 : index
    %c0_79 = arith.constant 0 : index
    %76 = vector.load %arg5[%c0_77, %c0_78, %c0_79] : memref<1x8x384xf32, #tpu.memory_space<vmem>>, vector<1x8x384xf32>
    %77 = vector.shape_cast %76 : vector<1x8x384xf32> to vector<8x384xf32>
    %78 = vector.shape_cast %75 : vector<8x384xf32> to vector<1x8x384xf32>
    tpu.vector_store %arg5[%c0_77, %c0_78, %c0_79], %78 {strides = array<i32>} : memref<1x8x384xf32, #tpu.memory_space<vmem>>, vector<1x8x384xf32>,
    return
  }
  func.func @transform_0(%arg0: i32, %arg1: i32) -> (i32, i32, i32) {
    %c0_i32 = arith.constant 0 : i32
    %c0_i32_0 = arith.constant 0 : i32
    %c0_i32_1 = arith.constant 0 : i32
    return %arg0, %c0_i32, %c0_i32_0 : i32, i32, i32
  }
  func.func @transform_1(%arg0: i32, %arg1: i32) -> (i32, i32, i32) {
    %c0_i32 = arith.constant 0 : i32
    %c0_i32_0 = arith.constant 0 : i32
    %c0_i32_1 = arith.constant 0 : i32
    return %c0_i32, %arg1, %c0_i32_0 : i32, i32, i32
  }
  func.func @transform_2(%arg0: i32, %arg1: i32) -> (i32, i32) {
    %c0_i32 = arith.constant 0 : i32
    %c0_i32_0 = arith.constant 0 : i32
    %c0_i32_1 = arith.constant 0 : i32
    return %c0_i32, %c0_i32_0 : i32, i32
  }
  func.func @transform_3(%arg0: i32, %arg1: i32) -> (i32, i32, i32) {
    %c0_i32 = arith.constant 0 : i32
    %c0_i32_0 = arith.constant 0 : i32
    return %arg0, %arg1, %c0_i32 : i32, i32, i32
  }
}

</mosaic_0001>

<bundles_post_ra>
// kernel: tpu_custom_call.1
= control target key start
LH: loop header
LB: loop body
LE: loop exit
PB: predicated region body
PF: predicated region fallthrough
CT: control target
= control target key end

     0   :  { %8 = vsyncpa [#allocation5], 0  ;;  %s1650_s0 = inlined_call_operand.hbm [shape: bf16[2,4,512], index: 0, kind: input, shape index: {}]   ;;  %s1651_s1 = inlined_call_operand.hbm [shape: bf16[3,8,12], index: 1, kind: input, shape index: {}]   ;;  %s1652_s2 = inlined_call_operand.vmem [shape: f32[1,384], index: 2, kind: input, shape index: {}]   ;;  %s1653_s3 = inlined_call_operand.hbm [shape: f32[2,8,384], index: 3, kind: output, shape index: {}]  }
   0x1   :  { %10 = vsyncpa [#allocation5 + $0x1], 0 }
   0x2   :  { %11 = vsyncpa [#allocation8], 0 }
   0x3   :  { %12 = vsyncpa [#allocation6], 0 }
   0x4   :  { %14 = vsyncpa [#allocation6 + $0x1], 0  ;;  %s1381_s12 = smov 0   ;;  %s1383_s13 = smov 0  }
   0x5   :  { %s1385_s14 = smov 0   ;;  %s1387_s15 = smov 0  }
   0x6   :  { %s1389_s16 = smov 0   ;;  %s1391_s17 = smov 0  }
   0x7 LB: > { %s1024_s18 = sadd.s32 4294967295, %s1342_s17   ;;  %s1025_s19 = sadd.s32 4294967294, %s1342_s17   ;;  %s1342_s17 = sphi %s1391_s17, %s20_s17   ;;  %s1338_s16 = sphi %s1389_s16, %s1677_s16   ;;  %s1334_s15 = sphi %s1387_s15, %s1676_s15   ;;  %s1330_s14 = sphi %s1385_s14, %s1675_s14   ;;  %s1326_s13 = sphi %s1383_s13, %s1674_s13   ;;  %s1322_s12 = sphi %s1381_s12, %s1673_s12  }
   0x8   : > { %p52_p0 = scmp.ne.s32.totalorder %s1326_s13, %s1322_s12  ;;  %p1415_p1 = scmp.eq.s32.totalorder %s1024_s18, 0 }
   0x9   : > { %p1419_p2 = scmp.eq.s32.totalorder %s1024_s18, 1  ;;  %p131_p3 = scmp.eq.s32.totalorder %s1025_s19, 1 }
   0xa   : > { %s1658_s20 = scalar_select %p1415_p1, 1, 0 }
   0xb   : > { %s1659_s21 = scalar_select %p1419_p2, 1, 0 }
   0xc   : > { %p1425_p4 = por %p1415_p1, %p52_p0  ;;  %p1026_p5 = scmp.ge.s32.totalorder %s1342_s17, 1 }
   0xd   : > { %p1430_p6 = por %p131_p3, %p52_p0  ;;  %p138_p7 = scmp.lt.s32.totalorder %s1342_s17, 3 }
   0xe   : > { %s1660_s22 = scalar_select %p1425_p4, 1, 0 }
   0xf   : > { %s1661_s23 = scalar_select %p1430_p6, 1, 0 }
  0x10   : > { %p1435_p8 = pnand %p1026_p5, %p138_p7  ;;  %s1344_s25 = smov [#allocation7]  }
  0x11   : > { %s152_s26 = sshll.u32 %s1344_s25, 4  ;;  %s32_s28 = sadd.s32 1, %s1338_s16  ;;  %s153_s26 = int_to_ptr.vmem [resolvable:$true] %s152_s26 }
  0x12   : > { %s1662_s24 = scalar_select %p1435_p8, 1, 0 }
  0x13   : > { %p1109_p9 = pneg %p1435_p8  ;;  %s1198_s4 = scalar_lea.hbm %s1651_s1, 192 }
  0x14   : > { %p1199_p12 = scmp.ne.s32.totalorder %s1651_s1, %s1198_s4  ;;  %p1205_p5 = scmp.lt.u32.totalorder %s1198_s4, %s1651_s1 }
  0x15   : > { %p1444_p11 = pnand %p1109_p9, %p1415_p1 }
  0x17   : > { %p1200_p13 = pneg %p1444_p11 }
  0x19   : > { %p1201_p0 = pnand %p1200_p13, %p1199_p12 }
  0x1b   : > { %p1202_p3 = pneg %p1201_p0 }
  0x1d   : > { %p1207_p7 = pnand %p1205_p5, %p1202_p3 }
  0x1f   : > { %1210 = shalt.err (!%p1207_p7)
}
  0x20   : > { %s1211_s9 = scalar_lea.vmem %s153_s26, 192  ;;  %p1219_p1 = scmp.lt.s32.totalorder %s153_s26, %s153_s26 }
  0x21   : > { %p1212_p9 = scmp.ne.s32.totalorder %s153_s26, %s1211_s9  ;;  %p1220_p4 = scmp.lt.s32.totalorder %s1211_s9, %s1211_s9 }
  0x23   : > { %p1214_p10 = pnand %p1212_p9, %p1200_p13  ;;  %p1221_p8 = por %p1220_p4, %p1219_p1 }
  0x25   : > { %p1215_p6 = pneg %p1214_p10 }
  0x27   : > { %p1222_p2 = pnand %p1221_p8, %p1215_p6 }
  0x29   : > { %1225 = shalt.err (!%p1222_p2)
}
  0x2a   : > { %s1345_s10 = smov 64   ;;  %s1346_s11 = smov 4  }
  0x2b   : > { %1112 = dma.hbm_to_vmem [thread:$0]  (!%p1444_p11), %s1651_s1, 192, %s153_s26, [#allocation8], %s1345_s10, %s1345_s10, %s1346_s11  }
  0x2c   : > { %p34_p1 = scmp.ge.s32.totalorder %s32_s28, 2  ;;  %s39_s25 = sadd.s32 1, %s1330_s14 }
  0x2d   : > { %p46_p2 = scmp.ne.s32.totalorder %s1330_s14, %s1326_s13  ;;  %p47_p4 = scmp.eq.s32.totalorder %s1342_s17, 0 }
  0x2e   : > { %s1679_s28 = smov (%p34_p1, %s32_s28), 0  ;;  %p1665_p8 = scmp.ne.s32.totalorder %s1659_s21, 0 }
  0x2f   : > { %p1471_p6 = por %p47_p4, %p46_p2  ;;  %s36_s27 = ssub.s32 %s1338_s16, %s1679_s28 }
  0x30   : > { %p1477_p10 = por %p1665_p8, %p46_p2  ;;  %p1122_p12 = scmp.lt.s32.totalorder %s1342_s17, 2 }
  0x31   : > { %p37_p11 = scmp.eq.s32.totalorder %s36_s27, 0  ;;  %s169_s26 = sand.u32 1, %s1330_s14  }
  0x32   : > { %s1029_s4 = sshll.u32 %s169_s26, 3  ;;  %s1058_s6 = sshll.u32 %s1338_s16, 7 }
  0x33   : > { %s1486_s5 = scalar_select %p37_p11, %s1330_s14, %s39_s25  }
  0x34   : > { %s1492_s9 = scalar_lea.hbm %s1650_s0, %s1058_s6  ;;  %s173_s21 = scalar_lea.vmem [#allocation4], %s1029_s4 }
  0x35   : > { %s181_s10 = sshll.u32 %s173_s21, 4  ;;  %p1498_p13 = pnand %p1122_p12, %p1471_p6  ;;  %s1494_s10 = int_to_ptr.vmem [resolvable:$true] %s181_s10 }
  0x36   : > { %s170_s18 = scalar_lea.sflag [#allocation5], %s169_s26  ;;  %s1226_s19 = scalar_lea.hbm %s1492_s9, 128 }
  0x37   : > { %p1227_p0 = scmp.ne.s32.totalorder %s1492_s9, %s1226_s19  ;;  %p1228_p3 = pneg %p1498_p13 }
  0x38   : > { %s1231_s4 = scalar_lea.hbm %s1650_s0, 256  ;;  %p1232_p9 = scmp.lt.u32.totalorder %s1492_s9, %s1650_s0 }
  0x39   : > { %p1229_p5 = pnand %p1228_p3, %p1227_p0  ;;  %p1233_p1 = scmp.lt.u32.totalorder %s1231_s4, %s1226_s19 }
  0x3a   : > { %p1235_p4 = scmp.lt.u32.totalorder %s1226_s19, %s1492_s9 }
  0x3b   : > { %p1230_p7 = pneg %p1229_p5  ;;  %p1234_p2 = por %p1233_p1, %p1232_p9 }
  0x3d   : > { %p1236_p6 = por %p1235_p4, %p1234_p2 }
  0x3f   : > { %p1237_p8 = pnand %p1236_p6, %p1230_p7 }
  0x41   : > { %1240 = shalt.err (!%p1237_p8)
}
  0x42   : > { %s1241_s26 = scalar_lea.vmem %s1494_s10, 128  ;;  %s1347_s7 = smov [#allocation4]  }
  0x43   : > { %p1242_p12 = scmp.ne.s32.totalorder %s1494_s10, %s1241_s26  ;;  %s1246_s8 = sshll.u32 %s1347_s7, 4  ;;  %s1247_s8 = int_to_ptr.vmem [resolvable:$false] %s1246_s8 }
  0x44   : > { %s1248_s21 = scalar_lea.vmem %s1247_s8, 256  ;;  %p1249_p5 = scmp.lt.s32.totalorder %s1494_s10, %s1247_s8 }
  0x45   : > { %p1244_p11 = pnand %p1242_p12, %p1228_p3  ;;  %p1250_p9 = scmp.lt.s32.totalorder %s1248_s21, %s1241_s26 }
  0x47   : > { %p1245_p0 = pneg %p1244_p11  ;;  %p1251_p1 = por %p1250_p9, %p1249_p5 }
  0x49   : > { %p1252_p2 = pnand %p1251_p1, %p1245_p0 }
  0x4b   : > { %1255 = shalt.err (!%p1252_p2)
}
  0x4c   : > { %1116 = dma.hbm_to_vmem [thread:$0]  (!%p1498_p13), %s1492_s9, 128, %s1494_s10, %s170_s18  }
  0x4d   : > { %p1668_p7 = scmp.ne.s32.totalorder %s1662_s24, 0 }
  0x4e   : > { %s1530_s19 = sand.u32 (!%p1668_p7), 1, %s1326_s13   ;;  %p1669_p3 = scmp.ne.s32.totalorder (!%p1668_p7), %s1660_s22, 0 }
  0x4f   : > { %190 = sbr.rel (%p1668_p7) target bundleno = 662 (0x296), region = 32  ;;  %s1033_s25 = sshll.u32 (!%p1668_p7), %s1530_s19, 3 }
  0x50   : > { %s193_s27 = scalar_lea.sflag (!%p1668_p7), [#allocation5], %s1530_s19  ;;  %s196_s4 = scalar_lea.vmem (!%p1668_p7), [#allocation4], %s1033_s25 }
  0x56   : > { %1309 = dma.done.wait (%p1669_p3), %s193_s27, 128  }
  0x57   : > { %1311 = vsyncadd (%p1669_p3), %s193_s27, 4294967168  ;;  %p1670_p4 = scmp.ne.s32.totalorder %s1658_s20, 0 }
  0x59   : > { %1313 = dma.done.wait (%p1670_p4), [#allocation8], 192  }
  0x5a   : > { %1315 = vsyncadd (%p1670_p4), [#allocation8], 4294967104  ;;  %v254_v0 = vlaneseq  ;;  %v1348_v1 = vmov 1983009808   ;;  %v280_v6 = vld [vmem:[%s196_s4] sm:$0xff]  ;;  %s1349_s22 = smov 126  }
  0x5b   : > { %v252_v2 = vunpack.c.l.s4 %v1348_v1  ;;  %v227_v7 = vld [vmem:[%s196_s4] sm:$0x3f]  ;;  %v282_v9 = vcombine.high %v280_v6, %v280_v6  ;;  %v250_v10 = vcombine.low %v280_v6, %v280_v6  ;;  %s1350_s24 = smov 127   ;;  %v1351_v14 = vmov 0.0   ;;  %s1353_s20 = smov 109  }
  0x5c   : > { %v1542_v3 = vshrl.u32 %v254_v0, 7  ;;  %v229_v11 = vcombine.high %v227_v7, %v227_v7  ;;  %1035 = vst.sshfl [vmem:[#allocation2] sm:$0xf pattern:$0x76325410] %v227_v7  ;;  %1065 = vmatprep.subr.bf16.mxu1 %v1351_v14  ;;  %vm1352_vm0 = vmmov 0  }
  0x5d   : > { %v253_v4 = vunpack.c.0.s8 %v252_v2  ;;  %1067 = vmatprep.mubr.msk.bf16.mxu1 %vm1352_vm0, %v1351_v14  ;;  %s1354_s9 = smov 110   ;;  %v1355_v15 = vmov 0   ;;  %s1356_s10 = smov 108   ;;  %vm273_vm1 = vcmask 1039360   ;;  %vm271_vm2 = vcmask 1043456  }
  0x5e   : > { %1036 = vst.sshfl [vmem:[#allocation2 + $0x8] sm:$0x3 pattern:$0x76325410] %v229_v11  ;;  %378 = vmatprep.mubr.bf16.mxu0 %v1355_v15  ;;  %s1357_s11 = smov 92   ;;  %s1358_s18 = smov 91  }
  0x5f   : > { %v256_v5 = vsub.s32 %v253_v4, %v1542_v3  ;;  %s1359_s29 = smov 90   ;;  %vm304_vm3 = vcmask 1031168   ;;  %vm488_vm4 = vcmask 891904   ;;  %vm457_vm5 = vcmask 900096   ;;  %v314_v59 = vld [vmem:[#allocation7] sm:$0xf] }
  0x60   : > { %vm336_vm6 = vcmask 1045504   ;;  %vm519_vm7 = vcmask 883712   ;;  %vm332_vm8 = vcmask 97280   ;;  %vm671_vm9 = vcmask 752640   ;;  %s1099_s7 = smul.u32 24, %s1530_s19 }
  0x61   : > { %v289_v8 = vrot.slane %v280_v6, %v256_v5  ;;  %v296_v12 = vrot.slane %v282_v9, %v256_v5  ;;  %v257_v13 = vrot.slane %v250_v10, %v256_v5  ;;  %vm702_vm10 = vcmask 744448   ;;  %s1100_s8 = smul.u32 384, %s1334_s15  ;;  %s915_s15 = scalar_lea.sflag [#allocation6], %s1530_s19 }
  0x62   : > { %vm733_vm11 = vcmask 736256   ;;  %s222_s21 = scalar_lea.vmem [#allocation9], %s1099_s7 }
  0x63   : > { %297 = vrot.lane.b32.xlu1 %v289_v8, %s1349_s22  ;;  %267 = vrot.lane.b32.xlu0 %v289_v8, %s1350_s24  ;;  %s931_s25 = sshll.u32 %s222_s21, 4  ;;  %s1603_s25 = int_to_ptr.vmem [resolvable:$true] %s931_s25 }
  0x67   : > { %299 = vrot.lane.b32.xlu1 %v296_v12, %s1349_s22  ;;  %265 = vrot.lane.b32.xlu0 %v257_v13, %s1350_s24  ;;  %s1601_s22 = scalar_lea.hbm %s1653_s3, %s1100_s8  ;;  %s1256_s24 = scalar_lea.vmem %s1603_s25, 384 }
  0x68   : > { %p1257_p13 = scmp.ne.s32.totalorder %s1603_s25, %s1256_s24 }
  0x6a   : > { %p1258_p6 = pnand %p1257_p13, %p1477_p10 }
  0x6b   : > { %483 = vrot.lane.b32.xlu1 %v289_v8, %s1353_s20  ;;  %450 = vrot.lane.b32.xlu0 %v289_v8, %s1354_s9 }
  0x6c   : > { %p1259_p8 = pneg %p1258_p6 }
  0x6f   : > { %452 = vrot.lane.b32.xlu1 %v296_v12, %s1354_s9  ;;  %481 = vrot.lane.b32.xlu0 %v257_v13, %s1353_s20  ;;  %s1360_s20 = smov [#allocation9]  }
  0x70   : > { %s1260_s9 = sshll.u32 %s1360_s20, 4  ;;  %s1261_s9 = int_to_ptr.vmem [resolvable:$false] %s1260_s9 }
  0x71   : > { %p1263_p12 = scmp.lt.s32.totalorder %s1603_s25, %s1261_s9 }
  0x73   : > { %514 = vrot.lane.b32.xlu1 %v296_v12, %s1356_s10  ;;  %512 = vrot.lane.b32.xlu0 %v289_v8, %s1356_s10  ;;  %s1262_s10 = scalar_lea.vmem %s1261_s9, 768 }
  0x74   : > { %p1264_p11 = scmp.lt.s32.totalorder %s1262_s10, %s1256_s24 }
  0x76   : > { %p1265_p0 = por %p1264_p11, %p1263_p12 }
  0x77   : > { %666 = vrot.lane.b32.xlu1 %v296_v12, %s1357_s11  ;;  %664 = vrot.lane.b32.xlu0 %v289_v8, %s1357_s11 }
  0x78   : > { %p1266_p5 = pnand %p1265_p0, %p1259_p8 }
  0x7b   : > { %697 = vrot.lane.b32.xlu1 %v289_v8, %s1358_s18  ;;  %695 = vrot.lane.b32.xlu0 %v257_v13, %s1358_s18 }
  0x7f   : > { %728 = vrot.lane.b32.xlu1 %v296_v12, %s1359_s29  ;;  %726 = vrot.lane.b32.xlu0 %v289_v8, %s1359_s29 }
  0xd5   : > { %v298_v16 = vpop.permute.xlu1 %297  ;;  %v268_v17 = vpop.permute.xlu0 %267 }
  0xd6   : > { %v270_v18 = vrot.slane %v268_v17, 4  ;;  %v301_v22 = vrot.slane %v298_v16, 4 }
  0xd8   : > { %v275_v19 = vsel %vm273_vm1, %v268_v17, %v270_v18 }
  0xd9   : > { %279 = vst [vmem:[#allocation2 + $0x8] sm:$0xc] %v275_v19  ;;  %v300_v20 = vpop.permute.xlu1 %299  ;;  %v266_v21 = vpop.permute.xlu0 %265 }
  0xda   : > { %v302_v23 = vrot.slane %v300_v20, 4  ;;  %v269_v24 = vrot.slane %v266_v21, 4 }
  0xdc   : > { %v303_v25 = vsel %vm271_vm2, %v301_v22, %v302_v23  ;;  %v306_v26 = vsel %vm304_vm3, %v300_v20, %v302_v23  ;;  %v272_v27 = vsel %vm271_vm2, %v269_v24, %v270_v18 }
  0xdd   : > { %v305_v28 = vsel %vm304_vm3, %v298_v16, %v303_v25  ;;  %310 = vst [vmem:[#allocation2 + $0x14] sm:$0x3] %v306_v26  ;;  %v274_v29 = vsel %vm273_vm1, %v266_v21, %v272_v27  ;;  %v484_v30 = vpop.permute.xlu1 %483  ;;  %v451_v31 = vpop.permute.xlu0 %450  ;;  %v530_v26 = vld [vmem:[#allocation7 + $0x4] sm:$0xf] }
  0xde   : > { %309 = vst [vmem:[#allocation2 + $0xc] sm:$0x33] %v305_v28  ;;  %278 = vst [vmem:[#allocation2] sm:$0xcc] %v274_v29  ;;  %v486_v32 = vrot.slane %v484_v30, 4  ;;  %v454_v37 = vrot.slane %v451_v31, 4 }
  0xe0   : > { %v316_v33 = vld [vmem:[#allocation2 + $0x8] sm:$0xf]  ;;  %v490_v34 = vsel %vm488_vm4, %v484_v30, %v486_v32 }
  0xe1   : > { %494 = vst [vmem:[#allocation2 + $0x8] sm:$0xc] %v490_v34  ;;  %v453_v35 = vpop.permute.xlu1 %452  ;;  %v482_v36 = vpop.permute.xlu0 %481  ;;  %v744_v34 = vld [vmem:[#allocation7 + $0x8] sm:$0xf] }
  0xe2   : > { %v455_v38 = vrot.slane %v453_v35, 4  ;;  %v485_v39 = vrot.slane %v482_v36, 4 }
  0xe4   : > { %v456_v40 = vsel %vm271_vm2, %v454_v37, %v455_v38  ;;  %v459_v41 = vsel %vm457_vm5, %v453_v35, %v455_v38  ;;  %v487_v42 = vsel %vm271_vm2, %v485_v39, %v486_v32  ;;  %v318_v43 = vld [vmem:[#allocation2 + $0x14] sm:$0x3]  ;;  %v872_v35 = vsub.s32 1, %v1542_v3 }
  0xe5   : > { %v315_v44 = vld [vmem:[#allocation2] sm:$0xff]  ;;  %v458_v45 = vsel %vm457_vm5, %v451_v31, %v456_v40  ;;  %463 = vst [vmem:[#allocation2 + $0x8] sm:$0x3] %v459_v41  ;;  %v489_v46 = vsel %vm488_vm4, %v482_v36, %v487_v42  ;;  %v515_v47 = vpop.permute.xlu1 %514  ;;  %v513_v48 = vpop.permute.xlu0 %512  ;;  %v317_v49 = vld [vmem:[#allocation2 + $0xc] sm:$0x33]  ;;  %v1039_v50 = vcombine.low %v316_v33, %v318_v43  ;;  %v876_v36 = vsub.s32 2, %v1542_v3 }
  0xe6   : > { %462 = vst [vmem:[#allocation2] sm:$0x33] %v458_v45  ;;  %493 = vst [vmem:[#allocation2] sm:$0xcc] %v489_v46  ;;  %v517_v51 = vrot.slane %v515_v47, 4  ;;  %v516_v52 = vrot.slane %v513_v48, 4  ;;  %v1038_v53 = vcombine.high %v315_v44, %v317_v49  ;;  %v1037_v54 = vcombine.low %v315_v44, %v317_v49 }
  0xe7   : > { %v344_v55 = vsel %vm336_vm6, %v1039_v50, 0 }
  0xe8   : > { %v521_v56 = vsel %vm519_vm7, %v515_v47, %v517_v51  ;;  %v518_v57 = vsel %vm271_vm2, %v516_v52, %v517_v51  ;;  %1040 = vmatprep.subr.msk.bf16.mxu0 %vm336_vm6, %v1038_v53  ;;  %1066 = vmatpush3.bf16.msra.mxu1 %v344_v55  ;;  %v338_v58 = vsel %vm336_vm6, %v1037_v54, 0 }
  0xe9   : > { %v520_v60 = vsel %vm519_vm7, %v513_v48, %v518_v57  ;;  %525 = vst [vmem:[#allocation2 + $0x14] sm:$0x3] %v521_v56  ;;  %v667_v61 = vpop.permute.xlu1 %666  ;;  %v665_v62 = vpop.permute.xlu0 %664  ;;  %347 = vmatpush1.bf16.msra.mxu0 %v338_v58  ;;  %1071 = vmatprep.subr.bf16.mxu1 %v1351_v14 }
  0xea   : > { %524 = vst [vmem:[#allocation2 + $0xc] sm:$0x33] %v520_v60  ;;  %v669_v63 = vrot.slane %v667_v61, 4  ;;  %v668_v0 = vrot.slane %v665_v62, 4 }
  0xeb   : > { %1068 = vmatmul.mubr.msk.bf16.vlgmr.msra.gmra.mrb[0].mxu1 %vm332_vm8, %v314_v59 }
  0xec   : > { %v670_v1 = vsel %vm271_vm2, %v668_v0, %v669_v63  ;;  %1041 = vmatmul.mubr.msk.bf16.vlgmr.msra.gmra.mrb[0].mxu0 %vm332_vm8, %v314_v59  ;;  %1073 = vmatprep.mubr.msk.bf16.mxu1 %vm1352_vm0, %v1351_v14  ;;  %v673_v9 = vsel %vm671_vm9, %v667_v61, %v669_v63 }
  0xed   : > { %v531_v2 = vld [vmem:[#allocation2] sm:$0xff]  ;;  %v672_v4 = vsel %vm671_vm9, %v665_v62, %v670_v1  ;;  %v698_v5 = vpop.permute.xlu1 %697  ;;  %v696_v6 = vpop.permute.xlu0 %695  ;;  %592 = vmatprep.mubr.bf16.mxu0 %v1355_v15 }
  0xee   : > { %676 = vst [vmem:[#allocation2] sm:$0x33] %v672_v4  ;;  %v700_v7 = vrot.slane %v698_v5, 4  ;;  %v699_v8 = vrot.slane %v696_v6, 4 }
  0xf0   : > { %v704_v10 = vsel %vm702_vm10, %v698_v5, %v700_v7  ;;  %v701_v11 = vsel %vm271_vm2, %v699_v8, %v700_v7  ;;  %v1191_v12 = vld [vmem:[#allocation2 + $0x8] ss:$12 sps:$4 sm:$0x3f]  }
  0xf1   : > { %v703_v13 = vsel %vm702_vm10, %v696_v6, %v701_v11  ;;  %v729_v16 = vpop.permute.xlu1 %728  ;;  %v533_v17 = vld [vmem:[#allocation2 + $0xc] sm:$0x33]  ;;  %v727_v18 = vpop.permute.xlu0 %726  ;;  %677 = vst [vmem:[#allocation2 + $0x8] sm:$0x3] %v673_v9  ;;  %708 = vst [vmem:[#allocation2 + $0x8] sm:$0xc] %v704_v10 }
  0xf2   : > { %707 = vst [vmem:[#allocation2] sm:$0xcc] %v703_v13  ;;  %v731_v19 = vrot.slane %v729_v16, 4  ;;  %v730_v20 = vrot.slane %v727_v18, 4  ;;  %v1044_v21 = vcombine.high %v531_v2, %v533_v17  ;;  %v558_v22 = vsel %vm336_vm6, %v1191_v12, 0 }
  0xf3   : > { %1072 = vmatpush3.bf16.msra.mxu1 %v558_v22  ;;  %v1043_v23 = vcombine.low %v531_v2, %v533_v17 }
  0xf4   : > { %v735_v24 = vsel %vm733_vm11, %v729_v16, %v731_v19  ;;  %v732_v25 = vsel %vm271_vm2, %v730_v20, %v731_v19  ;;  %1046 = vmatprep.subr.msk.bf16.mxu0 %vm336_vm6, %v1044_v21  ;;  %1077 = vmatprep.subr.bf16.mxu1 %v1351_v14 }
  0xf5   : > { %v734_v27 = vsel %vm733_vm11, %v727_v18, %v732_v25  ;;  %739 = vst [vmem:[#allocation2 + $0x14] sm:$0x3] %v735_v24  ;;  %v552_v28 = vsel %vm336_vm6, %v1043_v23, 0 }
  0xf6   : > { %738 = vst [vmem:[#allocation2 + $0xc] sm:$0x33] %v734_v27  ;;  %561 = vmatpush1.bf16.msra.mxu0 %v552_v28 }
  0xf7   : > { %1074 = vmatmul.mubr.msk.bf16.vlgmr.msra.gmra.mrb[0].mxu1 %vm332_vm8, %v530_v26 }
  0xf8   : > { %1079 = vmatprep.mubr.msk.bf16.mxu1 %vm1352_vm0, %v1351_v14  ;;  %v868_v14 = vsub.s32 0, %v1542_v3 }
  0xf9   : > { %1047 = vmatmul.mubr.msk.bf16.vlgmr.msra.gmra.mrb[0].mxu0 %vm332_vm8, %v530_v26 }
  0xfa   : > { %806 = vmatprep.mubr.bf16.mxu0 %v1355_v15  ;;  %v864_v15 = vld [vmem:[%s1652_s2] sm:$0x7] }
  0xfb   : > { %v869_v37 = vrot.slane %v864_v15, %v868_v14  ;;  %v873_v39 = vrot.slane %v864_v15, %v872_v35  ;;  %v877_v40 = vrot.slane %v864_v15, %v876_v36 }
  0xfc   : > { %v1194_v29 = vld [vmem:[#allocation2 + $0x8] ss:$12 sps:$4 sm:$0x3f]  }
  0xfd   : > { %v1192_v30 = vld [vmem:[#allocation2 + $0x4] ss:$12 sps:$4 sm:$0x3f]   ;;  %v772_v31 = vsel %vm336_vm6, %v1194_v29, 0 }
  0xfe   : > { %v1195_v32 = vld [vmem:[#allocation2] ss:$12 sps:$4 sm:$0x3f]   ;;  %1052 = vmatprep.subr.msk.bf16.mxu0 %vm336_vm6, %v1192_v30  ;;  %1078 = vmatpush3.bf16.msra.mxu1 %v772_v31 }
  0xff   : > { %v766_v33 = vsel %vm336_vm6, %v1195_v32, 0 }
 0x100   : > { %775 = vmatpush1.bf16.msra.mxu0 %v766_v33 }
 0x103   : > { %1080 = vmatmul.mubr.msk.bf16.vlgmr.msra.gmra.mrb[0].mxu1 %vm332_vm8, %v744_v34 }
 0x105   : > { %1053 = vmatmul.mubr.msk.bf16.vlgmr.msra.gmra.mrb[0].mxu0 %vm332_vm8, %v744_v34 }
 0x1d6   : > { %v849_v38 = vpop.f32.mrb[0].mxu1 }
 0x1d7   : > { %v1081_v41 = vpop.f32.mrb[1].mxu1  ;;  %v883_v49 = vmul.f32 %v877_v40, %v849_v38 }
 0x1d8   : > { %v808_v42 = vpop.f32.mrb[0].mxu0  ;;  %v852_v43 = vpop.f32.mrb[2].mxu1 }
 0x1d9   : > { %v881_v44 = vmul.f32 %v869_v37, %v808_v42  ;;  %v810_v45 = vpop.f32.mrb[1].mxu0  ;;  %v1082_v46 = vpop.f32.mrb[3].mxu1  ;;  %v890_v3 = vmul.f32 %v883_v49, %v849_v38 }
 0x1da   : > { %v882_v47 = vmul.f32 %v873_v39, %v810_v45  ;;  %v812_v48 = vpop.f32.mrb[2].mxu0 }
 0x1db   : > { %v888_v50 = vmul.f32 %v881_v44, %v808_v42  ;;  %v813_v51 = vpop.f32.mrb[3].mxu0 }
 0x1dc   : > { %v889_v52 = vmul.f32 %v882_v47, %v810_v45  ;;  %v884_v53 = vadd.f32 %v882_v47, %v881_v44 }
 0x1de   : > { %v885_v54 = vadd.f32 %v884_v53, %v883_v49  ;;  %v891_v55 = vadd.f32 %v889_v52, %v888_v50 }
 0x1e0   : > { %886 = vadd.xlane.f32.xlu0 %v885_v54  ;;  %v892_v56 = vadd.f32 %v891_v55, %v890_v3 }
 0x1e2   : > { %893 = vadd.xlane.f32.xlu1 %v892_v56 }
 0x26d   : > { %v887_v57 = vpop.xlane.xlu0 %886 }
 0x26e   : > { %v895_v58 = vmul.f32 0.00390625, %v887_v57 }
 0x26f   : > { %v894_v59 = vpop.xlane.xlu1 %893 }
 0x270   : > { %v896_v60 = vmul.f32 0.00390625, %v894_v59  ;;  %v897_v61 = vmul.f32 %v895_v58, %v895_v58  ;;  %v900_v1 = vsub.f32 %v808_v42, %v895_v58  ;;  %v901_v2 = vsub.f32 %v810_v45, %v895_v58 }
 0x271   : > { %v902_v4 = vsub.f32 %v849_v38, %v895_v58 }
 0x272   : > { %v898_v62 = vsub.f32 %v896_v60, %v897_v61 }
 0x274   : > { %v899_v63 = vmax.f32 %v898_v62, 0.0 }
 0x276   : > { %v903_v0 = vadd.f32 1e-05, %v899_v63 }
 0x278   : > { %1196 = vrsqrt.f32 %v903_v0 }
 0x282   : > { %v1197_v5 = vpop.eup %1196 }
 0x283   : > { %v905_v6 = vmul.f32 %v1197_v5, %v900_v1  ;;  %v906_v7 = vmul.f32 %v1197_v5, %v901_v2  ;;  %v907_v8 = vmul.f32 %v1197_v5, %v902_v4 }
 0x285   : > { %v908_v9 = vmax.f32 %v905_v6, 0.0  ;;  %v909_v10 = vmax.f32 %v906_v7, 0.0  ;;  %v910_v11 = vmax.f32 %v907_v8, 0.0 }
 0x287   : > { %911 = vst [vmem:[%s222_s21] sm:$0xff] %v908_v9  ;;  %912 = vst [vmem:[%s222_s21 + $0x8] sm:$0xff] %v909_v10 }
 0x288   : > { %913 = vst [vmem:[%s222_s21 + $0x10] sm:$0xff] %v910_v11 }
 0x289   : > { %1269 = shalt.err (!%p1266_p5)
}
 0x28a   : > { %s1270_s19 = scalar_lea.hbm %s1601_s22, 384  ;;  %s1274_s29 = scalar_lea.hbm %s1653_s3, 768 }
 0x28b   : > { %p1271_p9 = scmp.ne.s32.totalorder %s1601_s22, %s1270_s19  ;;  %p1275_p7 = scmp.lt.u32.totalorder %s1601_s22, %s1653_s3 }
 0x28c   : > { %p1276_p3 = scmp.lt.u32.totalorder %s1274_s29, %s1270_s19  ;;  %p1278_p13 = scmp.lt.u32.totalorder %s1270_s19, %s1601_s22 }
 0x28d   : > { %p1272_p1 = pnand %p1271_p9, %p1477_p10 }
 0x28e   : > { %p1277_p4 = por %p1276_p3, %p1275_p7 }
 0x28f   : > { %p1273_p2 = pneg %p1272_p1 }
 0x290   : > { %p1279_p6 = por %p1278_p13, %p1277_p4 }
 0x292   : > { %p1280_p8 = pnand %p1279_p6, %p1273_p2 }
 0x294   : > { %1283 = shalt.err (!%p1280_p8)
}
 0x295   : > { %1107 = dma.vmem_to_hbm [thread:$0]  (%p1477_p10), %s1603_s25, 384, %s1601_s22, %s915_s15  }
 0x296 PF: > { %s943_s7 = sand.u32 1, %s1322_s12   ;;  %p1671_p12 = scmp.ne.s32.totalorder %s1661_s23, 0 }
 0x297   : > { %p1672_p11 = scmp.ge.s32.totalorder %s1342_s17, 2  ;;  %s944_s8 = scalar_lea.sflag [#allocation6], %s943_s7 }
 0x299   : > { %p1118_p0 = pnand %p1672_p11, %p1671_p12 }
 0x29b   : > { %1317 = dma.done.wait (!%p1118_p0), %s944_s8, 384  }
 0x29c   : > { %1319 = vsyncadd (!%p1118_p0), %s944_s8, 4294966912  ;;  %s20_s17 = sadd.s32 1, %s1342_s17   ;;  %s1673_s12 = smov %s1326_s13 }
 0x29d   : > { %p17_p5 = scmp.ge.s32.totalorder %s20_s17, 4   ;;  %s1674_s13 = smov %s1330_s14 }
 0x29e   : > { %s1675_s14 = smov %s1486_s5  ;;  %s1676_s15 = smov %s1338_s16 }
 0x29f   : > { %s1677_s16 = smov %s1679_s28  ;;  %19 = sbr.rel (!%p17_p5) target bundleno = 7 (0x7), region = 84 }
 0x2a6   :  { %949 = vsyncpa [#allocation5], 1 }
 0x2a7   :  { %951 = vsyncpa [#allocation5 + $0x1], 1 }
 0x2a8   :  { %952 = vsyncpa [#allocation8], 1 }
 0x2a9   :  { %953 = vsyncpa [#allocation6], 1 }
 0x2aa   :  { %955 = vsyncpa [#allocation6 + $0x1], 1 }

</bundles_post_ra>
